<compile_context>
chip_gen: v7x
topology: tpu7x:2x2x1
jax: 0.10.0
libtpu: 0.0.40
codegen_flags: <defaults>
</compile_context>

<pallas_src>
import functools

import jax
import jax.numpy as jnp
from jax.experimental import pallas as pl
from jax.experimental.pallas import tpu as pltpu


def _tpu_vmem_bytes():
    """Physical VMEM per TensorCore; conservative fallback if query fails."""
    try:
        return int(pltpu.get_tpu_info().vmem_capacity_bytes)
    except Exception:
        return 64 * 1024 * 1024  # v7x per-TC VMEM (smallest of the family)


def _bn_pad_nhwc_kernel(scale_ref, shift_ref, x_ref, o_ref, *, pad, h, w,
                        compute_dtype):
    # scale_ref/shift_ref: (1, TC) float32 per-channel affine (C on lanes)
    # x_ref:               (H, W, TC) input block
    # o_ref:               (H+2P, W+2P, TC) output block
    s = scale_ref[...].reshape(1, 1, -1).astype(compute_dtype)
    t = shift_ref[...].reshape(1, 1, -1).astype(compute_dtype)

    # Single fused multiply-add over the whole block (memory-bound; one pass).
    y = (x_ref[...].astype(compute_dtype) * s + t).astype(o_ref.dtype)

    if pad == 0:
        o_ref[...] = y
        return

    p = pad
    hp, wp = h + 2 * p, w + 2 * p
    tc = o_ref.shape[-1]
    pad_val = t.astype(o_ref.dtype)  # (1, 1, TC); border value == BN(0) == shift

    # Write every output element exactly once (no fill-then-overwrite):
    # 4 border strips + one lane-dense interior store.  The +p offsets sit in
    # the untiled H dim / sublane W dim, never in the lane (channel) dim.
    o_ref[0:p, :, :] = jnp.broadcast_to(pad_val, (p, wp, tc))           # top
    o_ref[p + h:hp, :, :] = jnp.broadcast_to(pad_val, (p, wp, tc))      # bottom
    o_ref[p:p + h, 0:p, :] = jnp.broadcast_to(pad_val, (h, p, tc))      # left
    o_ref[p:p + h, p + w:wp, :] = jnp.broadcast_to(pad_val, (h, p, tc)) # right
    o_ref[p:p + h, p:p + w, :] = y                                      # interior


def bn_and_pad_nhwc(x, gamma, beta, running_mean, running_var, *,
                    eps=1e-5, pad_pixels=1, channel_block=None,
                    compute_dtype=None):
    """Eval-mode BNAndPadLayer forward on a channels-last (B, H, W, C) input.

    Returns (B, H + 2P, W + 2P, C) with x.dtype.
    """
    B, H, W, C = x.shape
    P = int(pad_pixels)
    Hp, Wp = H + 2 * P, W + 2 * P
    out_dtype = x.dtype

    if compute_dtype is None:
        # bf16 VALU on v6e/v7x: halve vreg pressure for bf16 activations.
        compute_dtype = jnp.bfloat16 if x.dtype == jnp.bfloat16 else jnp.float32

    # Fold BN running stats into per-channel scale/shift (tiny (C,) vectors).
    inv_std = jax.lax.rsqrt(running_var.astype(jnp.float32) + jnp.float32(eps))
    scale_v = gamma.astype(jnp.float32) * inv_std
    shift_v = beta.astype(jnp.float32) - running_mean.astype(jnp.float32) * scale_v
    scale = scale_v.reshape(1, C)
    shift = shift_v.reshape(1, C)

    # ---- dtype-aware, per-chip tile sizing ---------------------------------
    in_item = x.dtype.itemsize
    out_item = jnp.dtype(out_dtype).itemsize
    per_chan_bytes = H * W * in_item + Hp * Wp * out_item  # in + out per channel

    phys_vmem = _tpu_vmem_bytes()
    # ~5/8 of physical VMEM as scoped limit (40 MiB on v7x, 80 MiB on v5e/v6e).
    scoped_cap = min(phys_vmem * 5 // 8, 96 * 1024 * 1024)
    # Blocks are double-buffered by the pipeline; leave headroom for scratch.
    block_budget = (scoped_cap * 3 // 4) // 2

    if channel_block is not None:
        tc = min(int(channel_block), C)
        if tc != C and tc % 128 != 0:
            raise ValueError("channel_block must be a multiple of 128 or >= C")
    else:
        fit = max(1, block_budget // per_chan_bytes)
        if fit >= C or C <= 128:
            tc = C                                  # full-C block (lane dim == array dim)
        else:
            tc = min(C, max(128, (fit // 128) * 128))  # lane-dense multiple of 128
    n_cb = pl.cdiv(C, tc)  # ragged last block OK: OOB lanes masked on writeback

    # v7x megacore: keep >= 2 "parallel" grid steps when B == 1 and C allows it.
    if B * n_cb == 1 and C >= 256 and C % 256 == 0:
        tc = C // 2
        n_cb = 2

    working = 2 * tc * per_chan_bytes + 8 * C  # dbl-buffered blocks + scale/shift
    vmem_limit = int(min(scoped_cap, max(working * 5 // 4 + (2 << 20), 16 << 20)))

    # Memory-bound op: tell the XLA scheduler what it costs.
    bytes_accessed = (B * C * H * W * in_item + B * C * Hp * Wp * out_item
                      + 2 * C * 4)
    cost = pl.CostEstimate(flops=2 * B * C * H * W, transcendentals=0,
                           bytes_accessed=bytes_accessed)

    kernel = functools.partial(_bn_pad_nhwc_kernel, pad=P, h=H, w=W,
                               compute_dtype=compute_dtype)

    return pl.pallas_call(
        kernel,
        out_shape=jax.ShapeDtypeStruct((B, Hp, Wp, C), out_dtype),
        grid=(B, n_cb),
        in_specs=[
            # scale/shift: tiny (1, tc) lane vectors; block index constant in b,
            # so the pipeline only re-fetches them when the channel block changes.
            pl.BlockSpec((1, tc), lambda b, c: (0, c)),
            pl.BlockSpec((1, tc), lambda b, c: (0, c)),
            # x: batch dim squeezed (None) -> 3-D (H, W, tc) ref in the kernel.
            pl.BlockSpec((None, H, W, tc), lambda b, c: (b, 0, 0, c)),
        ],
        out_specs=pl.BlockSpec((None, Hp, Wp, tc), lambda b, c: (b, 0, 0, c)),
        compiler_params=pltpu.CompilerParams(
            dimension_semantics=("parallel", "parallel"),
            vmem_limit_bytes=vmem_limit,
        ),
        cost_estimate=cost,
    )(scale, shift, x)


def bn_and_pad(x, gamma, beta, running_mean, running_var, *,
               eps=1e-5, pad_pixels=1, channel_block=None, compute_dtype=None):
    """NCHW interface matching the PyTorch module.

    Internally runs the lane-dense NHWC kernel; the two transposes are layout
    plumbing for the PyTorch-shaped test.  In a full network port keep
    activations NHWC and call bn_and_pad_nhwc directly.
    """
    x_nhwc = jnp.transpose(x, (0, 2, 3, 1))
    out_nhwc = bn_and_pad_nhwc(x_nhwc, gamma, beta, running_mean, running_var,
                               eps=eps, pad_pixels=pad_pixels,
                               channel_block=channel_block,
                               compute_dtype=compute_dtype)
    return jnp.transpose(out_nhwc, (0, 3, 1, 2))


def bn_and_pad_ref(x, gamma, beta, running_mean, running_var, *,
                   eps=1e-5, pad_pixels=1):
    """Pure-JAX NCHW reference matching the PyTorch eval-mode forward."""
    x = x.astype(jnp.float32)
    scale = gamma / jnp.sqrt(running_var + eps)
    shift = beta - running_mean * scale
    y = x * scale[None, :, None, None] + shift[None, :, None, None]
    P = pad_pixels
    if P > 0:
        y = jnp.pad(y, ((0, 0), (0, 0), (P, P), (P, P)))
        pv = shift[None, :, None, None]
        y = y.at[:, :, :P, :].set(pv)
        y = y.at[:, :, -P:, :].set(pv)
        y = y.at[:, :, :, :P].set(pv)
        y = y.at[:, :, :, -P:].set(pv)
    return y


if __name__ == "__main__":
    key = jax.random.PRNGKey(0)

    def make_case(k, B, C, H, W, dtype):
        kx, kg, kb, km, kv = jax.random.split(k, 5)
        x = jax.random.normal(kx, (B, C, H, W), dtype=jnp.float32).astype(dtype)
        gamma = 1.0 + 0.1 * jax.random.normal(kg, (C,), dtype=jnp.float32)
        beta = 0.1 * jax.random.normal(kb, (C,), dtype=jnp.float32)
        mean = 0.2 * jax.random.normal(km, (C,), dtype=jnp.float32)
        var = jnp.abs(1.0 + 0.2 * jax.random.normal(kv, (C,), dtype=jnp.float32))
        return x, gamma, beta, mean, var

    k1, k2, k3, k4 = jax.random.split(key, 4)

    # 1) Main case (module-consistent small shapes): NCHW f32, pad=1.
    x, g, b, m, v = make_case(k1, 2, 4, 16, 16, jnp.float32)
    out = jax.block_until_ready(bn_and_pad(x, g, b, m, v, eps=1e-5, pad_pixels=1))
    ref = bn_and_pad_ref(x, g, b, m, v, eps=1e-5, pad_pixels=1)
    assert out.shape == (2, 4, 18, 18), out.shape
    assert jnp.allclose(out, ref, atol=1e-5, rtol=1e-5), "case 1 mismatch"

    # 2) Channel-tiled path (two lane-dense 128-channel blocks), pad=2.
    x, g, b, m, v = make_case(k2, 1, 256, 8, 8, jnp.float32)
    out = jax.block_until_ready(
        bn_and_pad(x, g, b, m, v, pad_pixels=2, channel_block=128))
    ref = bn_and_pad_ref(x, g, b, m, v, pad_pixels=2)
    assert jnp.allclose(out, ref, atol=1e-5, rtol=1e-5), "case 2 mismatch"

    # 3) Ragged last channel block (C=192, tc=128): OOB lanes masked on write.
    x, g, b, m, v = make_case(k3, 1, 192, 8, 8, jnp.float32)
    out = jax.block_until_ready(
        bn_and_pad(x, g, b, m, v, pad_pixels=1, channel_block=128))
    ref = bn_and_pad_ref(x, g, b, m, v, pad_pixels=1)
    assert jnp.allclose(out, ref, atol=1e-5, rtol=1e-5), "case 3 mismatch"

    # 4) bf16 activations: bf16 FMA path, dtype-aware block sizing.
    x, g, b, m, v = make_case(k4, 2, 8, 16, 16, jnp.bfloat16)
    out = jax.block_until_ready(bn_and_pad(x, g, b, m, v, pad_pixels=1))
    ref = bn_and_pad_ref(x, g, b, m, v, pad_pixels=1)
    assert out.dtype == jnp.bfloat16
    assert jnp.allclose(out.astype(jnp.float32), ref, atol=5e-2, rtol=5e-2), \
        "case 4 mismatch"

    print("KERNEL_OK")
</pallas_src>

<mosaic_0001>
module attributes {stable_mosaic.version = 11 : i64} {
  func.func @_bn_pad_nhwc_kernel(%arg0: i32, %arg1: i32, %arg2: memref<1x4xf32, #tpu.memory_space<vmem>>, %arg3: memref<1x4xf32, #tpu.memory_space<vmem>>, %arg4: memref<1x16x16x4xf32, #tpu.memory_space<vmem>>, %arg5: memref<1x18x18x4xf32, #tpu.memory_space<vmem>>) attributes {dimension_semantics = [#tpu.dimension_semantics<parallel>, #tpu.dimension_semantics<parallel>], iteration_bounds = array<i64: 2, 1>, scalar_prefetch = 0 : i64, scratch_operands = 0 : i64, tpu.core_type = #tpu.core_type<tc>, window_params = [{transform_indices = @transform_0, window_bounds = array<i64: 1, 4>}, {transform_indices = @transform_1, window_bounds = array<i64: 1, 4>}, {transform_indices = @transform_2, window_bounds = array<i64: 1, 16, 16, 4>}, {transform_indices = @transform_3, window_bounds = array<i64: 1, 18, 18, 4>}]} {
    %c0 = arith.constant 0 : index
    %c0_0 = arith.constant 0 : index
    %0 = vector.load %arg2[%c0, %c0_0] : memref<1x4xf32, #tpu.memory_space<vmem>>, vector<1x4xf32>
    %1 = vector.shape_cast %0 : vector<1x4xf32> to vector<1x1x4xf32>
    %c0_1 = arith.constant 0 : index
    %c0_2 = arith.constant 0 : index
    %2 = vector.load %arg3[%c0_1, %c0_2] : memref<1x4xf32, #tpu.memory_space<vmem>>, vector<1x4xf32>
    %3 = vector.shape_cast %2 : vector<1x4xf32> to vector<1x1x4xf32>
    %c0_3 = arith.constant 0 : index
    %c0_4 = arith.constant 0 : index
    %c0_5 = arith.constant 0 : index
    %c0_6 = arith.constant 0 : index
    %4 = vector.load %arg4[%c0_3, %c0_4, %c0_5, %c0_6] : memref<1x16x16x4xf32, #tpu.memory_space<vmem>>, vector<1x16x16x4xf32>
    %5 = vector.shape_cast %4 : vector<1x16x16x4xf32> to vector<16x16x4xf32>
    %6 = vector.broadcast %1 : vector<1x1x4xf32> to vector<16x16x4xf32>
    %7 = arith.mulf %5, %6 : vector<16x16x4xf32>
    %8 = vector.broadcast %3 : vector<1x1x4xf32> to vector<16x16x4xf32>
    %9 = arith.addf %7, %8 : vector<16x16x4xf32>
    %10 = vector.shape_cast %3 : vector<1x1x4xf32> to vector<1x1x4xf32>
    %11 = vector.broadcast %10 : vector<1x1x4xf32> to vector<1x18x4xf32>
    %c0_7 = arith.constant 0 : index
    %c0_8 = arith.constant 0 : index
    %c0_9 = arith.constant 0 : index
    %c0_10 = arith.constant 0 : index
    %12 = vector.load %arg5[%c0_7, %c0_8, %c0_9, %c0_10] : memref<1x18x18x4xf32, #tpu.memory_space<vmem>>, vector<1x1x18x4xf32>
    %13 = vector.shape_cast %12 : vector<1x1x18x4xf32> to vector<1x18x4xf32>
    %14 = vector.shape_cast %11 : vector<1x18x4xf32> to vector<1x1x18x4xf32>
    tpu.vector_store %arg5[%c0_7, %c0_8, %c0_9, %c0_10], %14 {strides = array<i32>} : memref<1x18x18x4xf32, #tpu.memory_space<vmem>>, vector<1x1x18x4xf32>,
    %15 = vector.shape_cast %3 : vector<1x1x4xf32> to vector<1x1x4xf32>
    %16 = vector.broadcast %15 : vector<1x1x4xf32> to vector<1x18x4xf32>
    %c0_11 = arith.constant 0 : index
    %c17 = arith.constant 17 : index
    %c0_12 = arith.constant 0 : index
    %c0_13 = arith.constant 0 : index
    %17 = vector.load %arg5[%c0_11, %c17, %c0_12, %c0_13] : memref<1x18x18x4xf32, #tpu.memory_space<vmem>>, vector<1x1x18x4xf32>
    %18 = vector.shape_cast %17 : vector<1x1x18x4xf32> to vector<1x18x4xf32>
    %19 = vector.shape_cast %16 : vector<1x18x4xf32> to vector<1x1x18x4xf32>
    tpu.vector_store %arg5[%c0_11, %c17, %c0_12, %c0_13], %19 {strides = array<i32>} : memref<1x18x18x4xf32, #tpu.memory_space<vmem>>, vector<1x1x18x4xf32>,
    %20 = vector.shape_cast %3 : vector<1x1x4xf32> to vector<1x1x4xf32>
    %21 = vector.broadcast %20 : vector<1x1x4xf32> to vector<16x1x4xf32>
    %c0_14 = arith.constant 0 : index
    %c1 = arith.constant 1 : index
    %c0_15 = arith.constant 0 : index
    %c0_16 = arith.constant 0 : index
    %22 = vector.load %arg5[%c0_14, %c1, %c0_15, %c0_16] : memref<1x18x18x4xf32, #tpu.memory_space<vmem>>, vector<1x16x1x4xf32>
    %23 = vector.shape_cast %22 : vector<1x16x1x4xf32> to vector<16x1x4xf32>
    %24 = vector.shape_cast %21 : vector<16x1x4xf32> to vector<1x16x1x4xf32>
    tpu.vector_store %arg5[%c0_14, %c1, %c0_15, %c0_16], %24 {strides = array<i32>} : memref<1x18x18x4xf32, #tpu.memory_space<vmem>>, vector<1x16x1x4xf32>,
    %25 = vector.shape_cast %3 : vector<1x1x4xf32> to vector<1x1x4xf32>
    %26 = vector.broadcast %25 : vector<1x1x4xf32> to vector<16x1x4xf32>
    %c0_17 = arith.constant 0 : index
    %c1_18 = arith.constant 1 : index
    %c17_19 = arith.constant 17 : index
    %c0_20 = arith.constant 0 : index
    %27 = vector.load %arg5[%c0_17, %c1_18, %c17_19, %c0_20] : memref<1x18x18x4xf32, #tpu.memory_space<vmem>>, vector<1x16x1x4xf32>
    %28 = vector.shape_cast %27 : vector<1x16x1x4xf32> to vector<16x1x4xf32>
    %29 = vector.shape_cast %26 : vector<16x1x4xf32> to vector<1x16x1x4xf32>
    tpu.vector_store %arg5[%c0_17, %c1_18, %c17_19, %c0_20], %29 {strides = array<i32>} : memref<1x18x18x4xf32, #tpu.memory_space<vmem>>, vector<1x16x1x4xf32>,
    %c0_21 = arith.constant 0 : index
    %c1_22 = arith.constant 1 : index
    %c1_23 = arith.constant 1 : index
    %c0_24 = arith.constant 0 : index
    %30 = vector.load %arg5[%c0_21, %c1_22, %c1_23, %c0_24] : memref<1x18x18x4xf32, #tpu.memory_space<vmem>>, vector<1x16x16x4xf32>
    %31 = vector.shape_cast %30 : vector<1x16x16x4xf32> to vector<16x16x4xf32>
    %32 = vector.shape_cast %9 : vector<16x16x4xf32> to vector<1x16x16x4xf32>
    tpu.vector_store %arg5[%c0_21, %c1_22, %c1_23, %c0_24], %32 {strides = array<i32>} : memref<1x18x18x4xf32, #tpu.memory_space<vmem>>, vector<1x16x16x4xf32>,
    return
  }
  func.func @transform_0(%arg0: i32, %arg1: i32) -> (i32, i32) {
    %c0_i32 = arith.constant 0 : i32
    %c0_i32_0 = arith.constant 0 : i32
    return %c0_i32, %arg1 : i32, i32
  }
  func.func @transform_1(%arg0: i32, %arg1: i32) -> (i32, i32) {
    %c0_i32 = arith.constant 0 : i32
    %c0_i32_0 = arith.constant 0 : i32
    return %c0_i32, %arg1 : i32, i32
  }
  func.func @transform_2(%arg0: i32, %arg1: i32) -> (i32, i32, i32, i32) {
    %c0_i32 = arith.constant 0 : i32
    %c0_i32_0 = arith.constant 0 : i32
    %c0_i32_1 = arith.constant 0 : i32
    return %arg0, %c0_i32, %c0_i32_0, %arg1 : i32, i32, i32, i32
  }
  func.func @transform_3(%arg0: i32, %arg1: i32) -> (i32, i32, i32, i32) {
    %c0_i32 = arith.constant 0 : i32
    %c0_i32_0 = arith.constant 0 : i32
    %c0_i32_1 = arith.constant 0 : i32
    return %arg0, %c0_i32, %c0_i32_0, %arg1 : i32, i32, i32, i32
  }
}

</mosaic_0001>

<bundles_post_ra>
// kernel: tpu_custom_call.1
= control target key start
LH: loop header
LB: loop body
LE: loop exit
PB: predicated region body
PF: predicated region fallthrough
CT: control target
= control target key end

     0   :  { %s673_s12 = smov 0   ;;  %s675_s13 = smov 0   ;;  %s962_s0 = inlined_call_operand.vmem [shape: f32[1,4], index: 0, kind: input, shape index: {}]   ;;  %s963_s1 = inlined_call_operand.vmem [shape: f32[1,4], index: 1, kind: input, shape index: {}]   ;;  %s964_s2 = inlined_call_operand.vmem [shape: f32[2,16,16,4], index: 2, kind: input, shape index: {}]   ;;  %s965_s3 = inlined_call_operand.vmem [shape: f32[2,18,18,4], index: 3, kind: output, shape index: {}]  }
   0x1   :  { %s677_s14 = smov 0  }
   0x2 LB: > { %s25_s15 = sadd.s32 1, %s647_s13  ;;  %p529_p0 = scmp.ge.s32.totalorder %s651_s14, 1  ;;  %s651_s14 = sphi %s677_s14, %s13_s14   ;;  %s647_s13 = sphi %s675_s13, %s967_s13   ;;  %s643_s12 = sphi %s673_s12, %s966_s12  }
   0x3   : > { %p27_p1 = scmp.ge.s32.totalorder %s25_s15, 2  ;;  %p172_p2 = scmp.lt.s32.totalorder %s651_s14, 3 }
   0x5   : > { %s969_s15 = smov (%p27_p1, %s25_s15), 0  ;;  %p173_p3 = pnand %p529_p0, %p172_p2 }
   0x6   : > { %p214_p4 = scmp.lt.s32.totalorder (!%p173_p3), %s643_s12, 1  ;;  %v303_v0 = vlaneseq (!%p173_p3)  ;;  %v231_v2 = vld [vmem:[%s963_s1] sm:$0x1] (!%p173_p3)  ;;  %vm350_vm0 = vcmask (!%p173_p3), 24576   ;;  %vm340_vm1 = vcmask (!%p173_p3), 31744   ;;  %vm343_vm2 = vcmask (!%p173_p3), 25600  }
   0x7   : > { %176 = sbr.rel (%p173_p3) target bundleno = 53 (0x35), region = 32  ;;  %v697_v4 = vld [vmem:[%s962_s0] ss:$0 sm:$0xff] (!%p173_p3) }
   0x8   : > { %v304_v1 = vshrl.u32 (!%p173_p3), %v303_v0, 7 }
   0xa   : > { %v305_v3 = vsub.s32 (!%p173_p3), 0, %v304_v1 }
   0xc   : > { %v709_v5 = vrot.slane (!%p173_p3), %v231_v2, %v305_v3 }
   0xe   : > { %s971_s12 = smov (!%p214_p4, %s643_s12), 1 }
   0xf   : > { %s604_s18 = smul.u32 432, %s971_s12  ;;  %s603_s19 = sshll.u32 %s971_s12, 8 }
  0x10   : > { %s702_s24 = scalar_lea.vmem %s964_s2, %s603_s19 }
  0x11   : > { %s707_s27 = scalar_lea.vmem %s965_s3, %s604_s18  ;;  %v232_v6 = vld [vmem:[%s702_s24] sm:$0xff]  ;;  %v233_v7 = vld [vmem:[%s702_s24 + $0x8] sm:$0xff]  ;;  %v234_v8 = vld [vmem:[%s702_s24 + $0x10] sm:$0xff] }
  0x12   : > { %537 = vst.msk [vmem:[%s707_s27 + $0x18] sm:$0x1] %vm350_vm0, %v231_v2  ;;  %538 = vst.msk [vmem:[%s707_s27 + $0x30] sm:$0x1] %vm350_vm0, %v231_v2  ;;  %v270_v9 = vmul.f32 %v697_v4, %v232_v6  ;;  %v271_v10 = vmul.f32 %v697_v4, %v233_v7  ;;  %v272_v11 = vmul.f32 %v697_v4, %v234_v8  ;;  %v235_v12 = vld [vmem:[%s702_s24 + $0x18] sm:$0xff]  ;;  %v236_v13 = vld [vmem:[%s702_s24 + $0x20] sm:$0xff] }
  0x13   : > { %539 = vst.msk [vmem:[%s707_s27 + $0x48] sm:$0x1] %vm350_vm0, %v231_v2  ;;  %540 = vst.msk [vmem:[%s707_s27 + $0x60] sm:$0x1] %vm350_vm0, %v231_v2  ;;  %v237_v14 = vld [vmem:[%s702_s24 + $0x28] sm:$0xff]  ;;  %v273_v15 = vmul.f32 %v697_v4, %v235_v12  ;;  %v274_v16 = vmul.f32 %v697_v4, %v236_v13  ;;  %v238_v18 = vld [vmem:[%s702_s24 + $0x30] sm:$0xff] }
  0x14   : > { %541 = vst.msk [vmem:[%s707_s27 + $0x78] sm:$0x1] %vm350_vm0, %v231_v2  ;;  %542 = vst.msk [vmem:[%s707_s27 + $0x90] sm:$0x1] %vm350_vm0, %v231_v2  ;;  %v275_v17 = vmul.f32 %v697_v4, %v237_v14  ;;  %v239_v19 = vld [vmem:[%s702_s24 + $0x38] sm:$0xff]  ;;  %v240_v20 = vld [vmem:[%s702_s24 + $0x40] sm:$0xff]  ;;  %v308_v21 = vadd.f32 %v709_v5, %v270_v9  ;;  %v309_v22 = vadd.f32 %v709_v5, %v271_v10 }
  0x15   : > { %543 = vst.msk [vmem:[%s707_s27 + $0xa8] sm:$0x1] %vm350_vm0, %v231_v2  ;;  %544 = vst.msk [vmem:[%s707_s27 + $0xc0] sm:$0x1] %vm350_vm0, %v231_v2  ;;  %v310_v23 = vadd.f32 %v709_v5, %v272_v11  ;;  %v276_v24 = vmul.f32 %v697_v4, %v238_v18  ;;  %v241_v25 = vld [vmem:[%s702_s24 + $0x48] sm:$0xff]  ;;  %v242_v26 = vld [vmem:[%s702_s24 + $0x50] sm:$0xff]  ;;  %v311_v28 = vadd.f32 %v709_v5, %v273_v15 }
  0x16   : > { %545 = vst.msk [vmem:[%s707_s27 + $0xd8] sm:$0x1] %vm350_vm0, %v231_v2  ;;  %546 = vst.msk [vmem:[%s707_s27 + $0xf0] sm:$0x1] %vm350_vm0, %v231_v2  ;;  %v243_v27 = vld [vmem:[%s702_s24 + $0x58] sm:$0xff]  ;;  %v312_v29 = vadd.f32 %v709_v5, %v274_v16  ;;  %v313_v30 = vadd.f32 %v709_v5, %v275_v17  ;;  %v277_v31 = vmul.f32 %v697_v4, %v239_v19  ;;  %v244_v32 = vld [vmem:[%s702_s24 + $0x60] sm:$0xff] }
  0x17   : > { %547 = vst.msk [vmem:[%s707_s27 + $0x108] sm:$0x1] %vm350_vm0, %v231_v2  ;;  %548 = vst.msk [vmem:[%s707_s27 + $0x120] sm:$0x1] %vm350_vm0, %v231_v2  ;;  %v245_v33 = vld [vmem:[%s702_s24 + $0x68] sm:$0xff]  ;;  %v246_v34 = vld [vmem:[%s702_s24 + $0x70] sm:$0xff]  ;;  %v314_v35 = vadd.f32 %v709_v5, %v276_v24  ;;  %v278_v36 = vmul.f32 %v697_v4, %v240_v20  ;;  %v279_v37 = vmul.f32 %v697_v4, %v241_v25 }
  0x18   : > { %549 = vst.msk [vmem:[%s707_s27 + $0x138] sm:$0x1] %vm350_vm0, %v231_v2  ;;  %550 = vst.msk [vmem:[%s707_s27 + $0x150] sm:$0x1] %vm350_vm0, %v231_v2  ;;  %v280_v38 = vmul.f32 %v697_v4, %v242_v26  ;;  %v247_v39 = vld [vmem:[%s702_s24 + $0x78] sm:$0xff]  ;;  %v315_v40 = vadd.f32 %v709_v5, %v277_v31  ;;  %v281_v41 = vmul.f32 %v697_v4, %v243_v27  ;;  %v248_v44 = vld [vmem:[%s702_s24 + $0x80] sm:$0xff] }
  0x19   : > { %551 = vst.msk [vmem:[%s707_s27 + $0x168] sm:$0x1] %vm350_vm0, %v231_v2  ;;  %552 = vst.msk [vmem:[%s707_s27 + $0x180] sm:$0x1] %vm350_vm0, %v231_v2  ;;  %v282_v42 = vmul.f32 %v697_v4, %v244_v32  ;;  %v283_v43 = vmul.f32 %v697_v4, %v245_v33  ;;  %v249_v45 = vld [vmem:[%s702_s24 + $0x88] sm:$0xff]  ;;  %v250_v46 = vld [vmem:[%s702_s24 + $0x90] sm:$0xff]  ;;  %v316_v47 = vadd.f32 %v709_v5, %v278_v36 }
  0x1a   : > { %553 = vst.msk [vmem:[%s707_s27 + $0x29] sm:$0x1] %vm350_vm0, %v231_v2  ;;  %554 = vst.msk [vmem:[%s707_s27 + $0x41] sm:$0x1] %vm350_vm0, %v231_v2  ;;  %v317_v48 = vadd.f32 %v709_v5, %v279_v37  ;;  %v318_v49 = vadd.f32 %v709_v5, %v280_v38  ;;  %v284_v50 = vmul.f32 %v697_v4, %v246_v34  ;;  %v251_v51 = vld [vmem:[%s702_s24 + $0x98] sm:$0xff]  ;;  %v252_v52 = vld [vmem:[%s702_s24 + $0xa0] sm:$0xff] }
  0x1b   : > { %555 = vst.msk [vmem:[%s707_s27 + $0x59] sm:$0x1] %vm350_vm0, %v231_v2  ;;  %556 = vst.msk [vmem:[%s707_s27 + $0x71] sm:$0x1] %vm350_vm0, %v231_v2  ;;  %v253_v53 = vld [vmem:[%s702_s24 + $0xa8] sm:$0xff]  ;;  %v319_v54 = vadd.f32 %v709_v5, %v281_v41  ;;  %v320_v55 = vadd.f32 %v709_v5, %v282_v42  ;;  %v321_v56 = vadd.f32 %v709_v5, %v283_v43  ;;  %v254_v58 = vld [vmem:[%s702_s24 + $0xb0] sm:$0xff] }
  0x1c   : > { %557 = vst.msk [vmem:[%s707_s27 + $0x89] sm:$0x1] %vm350_vm0, %v231_v2  ;;  %558 = vst.msk [vmem:[%s707_s27 + $0xa1] sm:$0x1] %vm350_vm0, %v231_v2  ;;  %v285_v57 = vmul.f32 %v697_v4, %v247_v39  ;;  %v322_v59 = vadd.f32 %v709_v5, %v284_v50  ;;  %v286_v60 = vmul.f32 %v697_v4, %v248_v44  ;;  %v255_v63 = vld [vmem:[%s702_s24 + $0xb8] sm:$0xff]  ;;  %v256_v6 = vld [vmem:[%s702_s24 + $0xc0] sm:$0xff] }
  0x1d   : > { %559 = vst.msk [vmem:[%s707_s27 + $0xb9] sm:$0x1] %vm350_vm0, %v231_v2  ;;  %560 = vst.msk [vmem:[%s707_s27 + $0xd1] sm:$0x1] %vm350_vm0, %v231_v2  ;;  %v287_v61 = vmul.f32 %v697_v4, %v249_v45  ;;  %v288_v62 = vmul.f32 %v697_v4, %v250_v46  ;;  %v289_v1 = vmul.f32 %v697_v4, %v251_v51  ;;  %v257_v7 = vld [vmem:[%s702_s24 + $0xc8] sm:$0xff]  ;;  %v258_v8 = vld [vmem:[%s702_s24 + $0xd0] sm:$0xff] }
  0x1e   : > { %561 = vst.msk [vmem:[%s707_s27 + $0xe9] sm:$0x1] %vm350_vm0, %v231_v2  ;;  %562 = vst.msk [vmem:[%s707_s27 + $0x101] sm:$0x1] %vm350_vm0, %v231_v2  ;;  %v323_v0 = vadd.f32 %v709_v5, %v285_v57  ;;  %v291_v3 = vmul.f32 %v697_v4, %v253_v53  ;;  %v324_v9 = vadd.f32 %v709_v5, %v286_v60  ;;  %v259_v13 = vld [vmem:[%s702_s24 + $0xd8] sm:$0xff]  ;;  %v260_v14 = vld [vmem:[%s702_s24 + $0xe0] sm:$0xff] }
  0x1f   : > { %563 = vst.msk [vmem:[%s707_s27 + $0x119] sm:$0x1] %vm350_vm0, %v231_v2  ;;  %564 = vst.msk [vmem:[%s707_s27 + $0x131] sm:$0x1] %vm350_vm0, %v231_v2  ;;  %v325_v10 = vadd.f32 %v709_v5, %v287_v61  ;;  %v326_v11 = vadd.f32 %v709_v5, %v288_v62  ;;  %v292_v12 = vmul.f32 %v697_v4, %v254_v58  ;;  %v261_v15 = vld [vmem:[%s702_s24 + $0xe8] sm:$0xff]  ;;  %v262_v20 = vld [vmem:[%s702_s24 + $0xf0] sm:$0xff] }
  0x20   : > { %565 = vst.msk [vmem:[%s707_s27 + $0x149] sm:$0x1] %vm350_vm0, %v231_v2  ;;  %566 = vst.msk [vmem:[%s707_s27 + $0x161] sm:$0x1] %vm350_vm0, %v231_v2  ;;  %v327_v16 = vadd.f32 %v709_v5, %v289_v1  ;;  %v329_v18 = vadd.f32 %v709_v5, %v291_v3  ;;  %v293_v19 = vmul.f32 %v697_v4, %v255_v63  ;;  %v263_v25 = vld [vmem:[%s702_s24 + $0xf8] sm:$0xff] }
  0x21   : > { %567 = vst.msk [vmem:[%s707_s27 + $0x179] sm:$0x1] %vm350_vm0, %v231_v2  ;;  %568 = vst.msk [vmem:[%s707_s27 + $0x191] sm:$0x1] %vm350_vm0, %v231_v2  ;;  %v290_v2 = vmul.f32 %v697_v4, %v252_v52  ;;  %v296_v24 = vmul.f32 %v697_v4, %v258_v8  ;;  %v297_v27 = vmul.f32 %v697_v4, %v259_v13 }
  0x22   : > { %341 = vst.msk [vmem:[%s707_s27] sm:$0xff] %vm340_vm1, %v709_v5  ;;  %342 = vst.msk [vmem:[%s707_s27 + $0x8] sm:$0xff] %vm340_vm1, %v709_v5  ;;  %v331_v26 = vadd.f32 %v709_v5, %v293_v19  ;;  %v300_v33 = vmul.f32 %v697_v4, %v262_v20  ;;  %v301_v37 = vmul.f32 %v697_v4, %v263_v25 }
  0x23   : > { %534 = vst.msk [vmem:[%s707_s27 + $0x198] sm:$0xff] %vm340_vm1, %v709_v5  ;;  %535 = vst.msk [vmem:[%s707_s27 + $0x1a0] sm:$0xff] %vm340_vm1, %v709_v5  ;;  %v328_v17 = vadd.f32 %v709_v5, %v290_v2  ;;  %v334_v32 = vadd.f32 %v709_v5, %v296_v24  ;;  %v335_v34 = vadd.f32 %v709_v5, %v297_v27 }
  0x24   : > { %344 = vst.msk [vmem:[%s707_s27 + $0x10] sm:$0x3] %vm343_vm2, %v709_v5  ;;  %536 = vst.msk [vmem:[%s707_s27 + $0x1a8] sm:$0x3] %vm343_vm2, %v709_v5  ;;  %v338_v38 = vadd.f32 %v709_v5, %v300_v33  ;;  %v339_v39 = vadd.f32 %v709_v5, %v301_v37 }
  0x25   : > { %569 = vst.msk [vmem:[%s707_s27 + $0x19] sm:$0xff] %vm340_vm1, %v308_v21  ;;  %570 = vst.msk [vmem:[%s707_s27 + $0x21] sm:$0xff] %vm340_vm1, %v309_v22  ;;  %v330_v21 = vadd.f32 %v709_v5, %v292_v12  ;;  %v294_v22 = vmul.f32 %v697_v4, %v256_v6 }
  0x26   : > { %571 = vst.msk [vmem:[%s707_s27 + $0x31] sm:$0xff] %vm340_vm1, %v310_v23  ;;  %572 = vst.msk [vmem:[%s707_s27 + $0x39] sm:$0xff] %vm340_vm1, %v311_v28  ;;  %v295_v23 = vmul.f32 %v697_v4, %v257_v7  ;;  %v298_v28 = vmul.f32 %v697_v4, %v260_v14 }
  0x27   : > { %573 = vst.msk [vmem:[%s707_s27 + $0x49] sm:$0xff] %vm340_vm1, %v312_v29  ;;  %574 = vst.msk [vmem:[%s707_s27 + $0x51] sm:$0xff] %vm340_vm1, %v313_v30  ;;  %v299_v29 = vmul.f32 %v697_v4, %v261_v15  ;;  %v332_v30 = vadd.f32 %v709_v5, %v294_v22 }
  0x28   : > { %575 = vst.msk [vmem:[%s707_s27 + $0x61] sm:$0xff] %vm340_vm1, %v314_v35  ;;  %576 = vst.msk [vmem:[%s707_s27 + $0x69] sm:$0xff] %vm340_vm1, %v315_v40  ;;  %v333_v31 = vadd.f32 %v709_v5, %v295_v23  ;;  %v336_v35 = vadd.f32 %v709_v5, %v298_v28 }
  0x29   : > { %577 = vst.msk [vmem:[%s707_s27 + $0x79] sm:$0xff] %vm340_vm1, %v316_v47  ;;  %578 = vst.msk [vmem:[%s707_s27 + $0x81] sm:$0xff] %vm340_vm1, %v317_v48  ;;  %v337_v36 = vadd.f32 %v709_v5, %v299_v29 }
  0x2a   : > { %579 = vst.msk [vmem:[%s707_s27 + $0x91] sm:$0xff] %vm340_vm1, %v318_v49  ;;  %580 = vst.msk [vmem:[%s707_s27 + $0x99] sm:$0xff] %vm340_vm1, %v319_v54 }
  0x2b   : > { %581 = vst.msk [vmem:[%s707_s27 + $0xa9] sm:$0xff] %vm340_vm1, %v320_v55  ;;  %582 = vst.msk [vmem:[%s707_s27 + $0xb1] sm:$0xff] %vm340_vm1, %v321_v56 }
  0x2c   : > { %583 = vst.msk [vmem:[%s707_s27 + $0xc1] sm:$0xff] %vm340_vm1, %v322_v59  ;;  %584 = vst.msk [vmem:[%s707_s27 + $0xc9] sm:$0xff] %vm340_vm1, %v323_v0 }
  0x2d   : > { %585 = vst.msk [vmem:[%s707_s27 + $0xd9] sm:$0xff] %vm340_vm1, %v324_v9  ;;  %586 = vst.msk [vmem:[%s707_s27 + $0xe1] sm:$0xff] %vm340_vm1, %v325_v10 }
  0x2e   : > { %587 = vst.msk [vmem:[%s707_s27 + $0xf1] sm:$0xff] %vm340_vm1, %v326_v11  ;;  %588 = vst.msk [vmem:[%s707_s27 + $0xf9] sm:$0xff] %vm340_vm1, %v327_v16 }
  0x2f   : > { %589 = vst.msk [vmem:[%s707_s27 + $0x109] sm:$0xff] %vm340_vm1, %v328_v17  ;;  %590 = vst.msk [vmem:[%s707_s27 + $0x111] sm:$0xff] %vm340_vm1, %v329_v18 }
  0x30   : > { %591 = vst.msk [vmem:[%s707_s27 + $0x121] sm:$0xff] %vm340_vm1, %v330_v21  ;;  %592 = vst.msk [vmem:[%s707_s27 + $0x129] sm:$0xff] %vm340_vm1, %v331_v26 }
  0x31   : > { %593 = vst.msk [vmem:[%s707_s27 + $0x139] sm:$0xff] %vm340_vm1, %v332_v30  ;;  %594 = vst.msk [vmem:[%s707_s27 + $0x141] sm:$0xff] %vm340_vm1, %v333_v31 }
  0x32   : > { %595 = vst.msk [vmem:[%s707_s27 + $0x151] sm:$0xff] %vm340_vm1, %v334_v32  ;;  %596 = vst.msk [vmem:[%s707_s27 + $0x159] sm:$0xff] %vm340_vm1, %v335_v34 }
  0x33   : > { %597 = vst.msk [vmem:[%s707_s27 + $0x169] sm:$0xff] %vm340_vm1, %v336_v35  ;;  %598 = vst.msk [vmem:[%s707_s27 + $0x171] sm:$0xff] %vm340_vm1, %v337_v36 }
  0x34   : > { %599 = vst.msk [vmem:[%s707_s27 + $0x181] sm:$0xff] %vm340_vm1, %v338_v38  ;;  %600 = vst.msk [vmem:[%s707_s27 + $0x189] sm:$0xff] %vm340_vm1, %v339_v39 }
  0x35 PF: > { %s13_s14 = sadd.s32 1, %s651_s14   ;;  %s966_s12 = smov %s647_s13 }
  0x36   : > { %p10_p5 = scmp.ge.s32.totalorder %s13_s14, 4   ;;  %s967_s13 = smov %s969_s15 }
  0x38   :  { %12 = sbr.rel (!%p10_p5) target bundleno = 2 (0x2), region = 70 }

</bundles_post_ra>
